<compile_context>
chip_gen: v6e
topology: v6e:2x2x1
jax: 0.10.0
libtpu: 0.0.40
codegen_flags: <defaults>
</compile_context>

<pallas_src>
import functools
import math

import jax
import jax.numpy as jnp
from jax.experimental import pallas as pl
from jax.experimental.pallas import tpu as pltpu


def gauss_black_kernel(x_ref, w1_ref, w2_ref, wd_ref, b1_ref, b2_ref, bd_ref, o_ref,
                       *, K, dil, W):
    """Fused GaussBlack forward on one block of whole rows of one sample.

    x_ref : (Cin, P)        f32 input block, P = rows_per_block * W (row-aligned)
    w1_ref: (K, Cout, Cin)  conv1 taps (weight-normed); index j <-> delay j*dil
    w2_ref: (Cout, K*Cout)  conv2 taps merged along the contraction axis
    wd_ref: (Cout, Cin)     1x1 downsample
    b*_ref: (Cout, 1)       biases (f32)
    o_ref : (Cout, P)       output block (lane-dense stores)
    """
    P = o_ref.shape[-1]
    x = x_ref[...].astype(jnp.float32)                              # (Cin, P)

    # Position within its row; valid because every block starts at a row boundary.
    pos = jax.lax.broadcasted_iota(jnp.int32, (1, P), 1) % W

    # ---- conv1: K causal taps via lane roll + per-row mask, f32 accumulation ----
    acc1 = jnp.dot(w1_ref[0], x, preferred_element_type=jnp.float32)        # tap 0
    for j in range(1, K):
        s = j * dil
        tap = jnp.where(pos >= s, pltpu.roll(x, shift=s, axis=1), 0.0)
        acc1 = acc1 + jnp.dot(w1_ref[j], tap, preferred_element_type=jnp.float32)
    h1 = jnp.tanh(acc1 + b1_ref[...])                                        # (Cout, P)
    # dropout1: identity (inference)

    # ---- conv2: merged single dot over K concatenated taps (8-row aligned) ----
    if K > 1:
        taps2 = [h1]
        for j in range(1, K):
            s = j * dil
            taps2.append(jnp.where(pos >= s, pltpu.roll(h1, shift=s, axis=1), 0.0))
        hcat = jnp.concatenate(taps2, axis=0)                                # (K*Cout, P)
    else:
        hcat = h1
    acc2 = jnp.dot(w2_ref[...], hcat, preferred_element_type=jnp.float32)
    h2 = jnp.tanh(acc2 + b2_ref[...])
    # dropout2: identity (inference)

    # ---- downsample (1x1 conv) residual on the un-shifted input ----
    res = jnp.dot(wd_ref[...], x, preferred_element_type=jnp.float32) + bd_ref[...]

    o_ref[...] = jnp.maximum(h2 + res, 0.0).astype(o_ref.dtype)


def weight_norm_effective(v, g):
    """PyTorch weight_norm(dim=0): w = g * v / ||v||  (norm over dims 1,2,3)."""
    norm = jnp.sqrt(jnp.sum(v * v, axis=(1, 2, 3), keepdims=True))
    return g.reshape(-1, 1, 1, 1) * v / norm


def _choose_block_hw(HW, W, target):
    """Largest tile of whole rows (multiple of both W and 128, dividing H*W) <= target;
    else the smallest such tile; else one full sample (tile = H*W, always legal)."""
    step = (W * 128) // math.gcd(W, 128)          # lcm(W, 128): row- and lane-aligned
    cands = [t for t in range(step, HW + 1, step) if HW % t == 0]
    if not cands:
        return HW
    under = [t for t in cands if t <= target]
    return max(under) if under else min(cands)


def _default_block_target():
    """~16K positions is v7x-safe (64 MiB VMEM, 2 TC); 128 MiB parts take 32K+."""
    try:
        info = pltpu.get_tpu_info()
        if getattr(info, "vmem_capacity_bytes", 0) >= 100 * 1024 * 1024:
            return 32768
    except Exception:
        pass
    return 16384


def gauss_black_forward(x, params, *, kernel_size, dilation,
                        block_target_positions=None, out_dtype=None):
    """x: NCHW float32. Returns NCHW (same dtype unless out_dtype given)."""
    N, Cin, H, W = x.shape
    K, dil = kernel_size, dilation
    HW = H * W

    w1 = weight_norm_effective(params["v1"], params["g1"])    # (Cout, Cin, 1, K)
    w2 = weight_norm_effective(params["v2"], params["g2"])    # (Cout, Cout, 1, K)
    Cout = w1.shape[0]

    # Tap j (delay j*dil) pairs with conv kernel index K-1-j.
    w1m = jnp.stack([w1[:, :, 0, K - 1 - j] for j in range(K)],
                    axis=0).astype(jnp.float32)                       # (K, Cout, Cin)
    w2m = jnp.concatenate([w2[:, :, 0, K - 1 - j] for j in range(K)],
                          axis=1).astype(jnp.float32)                 # (Cout, K*Cout)
    wdm = params["wd"][:, :, 0, 0].astype(jnp.float32)                # (Cout, Cin)

    b1 = params["b1"].reshape(Cout, 1).astype(jnp.float32)
    b2 = params["b2"].reshape(Cout, 1).astype(jnp.float32)
    bd = params["bd"].reshape(Cout, 1).astype(jnp.float32)

    if block_target_positions is None:
        block_target_positions = _default_block_target()
    tile_hw = _choose_block_hw(HW, W, block_target_positions)
    assert tile_hw % W == 0, "blocks must cover whole rows (causal mask uses pos % W)"
    nblk = HW // tile_hw

    x3 = x.reshape(N, Cin, HW)        # free, contiguous
    out_dtype = out_dtype or x.dtype

    # VMEM budget: double-buffered f32 in/out tiles + live f32 temporaries (+50% slack),
    # capped at 48 MiB so v7x (64 MiB/TC) never over-requests.
    blk_bytes = 4 * tile_hw * (2 * Cin + 2 * Cout            # double-buffered IO tiles
                               + 2 * Cin                     # x + one rolled tap
                               + (2 * K + 6) * Cout)         # h1/taps2/hcat/accs/h2/res
    vmem_limit = int(min(48 * 1024 * 1024,
                         max(16 * 1024 * 1024, (3 * blk_bytes) // 2)))

    kern = functools.partial(gauss_black_kernel, K=K, dil=dil, W=W)
    out = pl.pallas_call(
        kern,
        out_shape=jax.ShapeDtypeStruct((N, Cout, HW), out_dtype),
        grid=(N, nblk),
        in_specs=[
            pl.BlockSpec((None, Cin, tile_hw), lambda n, j: (n, 0, j)),   # x block
            pl.BlockSpec((K, Cout, Cin), lambda n, j: (0, 0, 0)),         # w1 (replicated)
            pl.BlockSpec((Cout, K * Cout), lambda n, j: (0, 0)),          # w2 (replicated)
            pl.BlockSpec((Cout, Cin), lambda n, j: (0, 0)),               # wd (replicated)
            pl.BlockSpec((Cout, 1), lambda n, j: (0, 0)),                 # b1
            pl.BlockSpec((Cout, 1), lambda n, j: (0, 0)),                 # b2
            pl.BlockSpec((Cout, 1), lambda n, j: (0, 0)),                 # bd
        ],
        out_specs=pl.BlockSpec((None, Cout, tile_hw), lambda n, j: (n, 0, j)),
        compiler_params=pltpu.CompilerParams(
            dimension_semantics=("parallel", "parallel"),
            vmem_limit_bytes=vmem_limit),
    )(x3, w1m, w2m, wdm, b1, b2, bd)

    return out.reshape(N, Cout, H, W)


def reference_forward(x, params, *, kernel_size, dilation):
    """Pure-JAX f32 reference matching the PyTorch module (eval mode)."""
    pad_w = (kernel_size - 1) * dilation
    w1 = weight_norm_effective(params["v1"], params["g1"])
    w2 = weight_norm_effective(params["v2"], params["g2"])

    def conv(inp, w, b, pad):
        out = jax.lax.conv_general_dilated(
            inp, w, window_strides=(1, 1),
            padding=((0, 0), (pad, pad)),
            rhs_dilation=(1, dilation),
            dimension_numbers=("NCHW", "OIHW", "NCHW"))
        return out + b.reshape(1, -1, 1, 1)

    def chomp(z):
        return z[:, :, :, :-pad_w] if pad_w else z

    o1 = jnp.tanh(chomp(conv(x, w1, params["b1"], pad_w)))
    o2 = jnp.tanh(chomp(conv(o1, w2, params["b2"], pad_w)))
    res = conv(x, params["wd"], params["bd"], 0)
    return jnp.maximum(o2 + res, 0.0)


def init_params(key, n_input, n_output, kernel_size):
    ks = jax.random.split(key, 6)
    v1 = 0.01 * jax.random.normal(ks[0], (n_output, n_input, 1, kernel_size), jnp.float32)
    v2 = 0.01 * jax.random.normal(ks[1], (n_output, n_output, 1, kernel_size), jnp.float32)
    wd = 0.01 * jax.random.normal(ks[2], (n_output, n_input, 1, 1), jnp.float32)
    # weight_norm's g initialized to ||v|| per output channel (PyTorch default)
    g1 = jnp.sqrt(jnp.sum(v1 * v1, axis=(1, 2, 3)))
    g2 = jnp.sqrt(jnp.sum(v2 * v2, axis=(1, 2, 3)))
    # PyTorch Conv2d default bias init: U(-1/sqrt(fan_in), 1/sqrt(fan_in))
    fan1 = n_input * kernel_size
    fan2 = n_output * kernel_size
    b1 = jax.random.uniform(ks[3], (n_output,), jnp.float32, -1.0, 1.0) / jnp.sqrt(fan1)
    b2 = jax.random.uniform(ks[4], (n_output,), jnp.float32, -1.0, 1.0) / jnp.sqrt(fan2)
    bd = jax.random.uniform(ks[5], (n_output,), jnp.float32, -1.0, 1.0) / jnp.sqrt(n_input)
    return dict(v1=v1, g1=g1, b1=b1, v2=v2, g2=g2, b2=b2, wd=wd, bd=bd)


if __name__ == "__main__":
    # Small NCHW shapes consistent with the module.
    N, C_IN, H, W = 2, 4, 8, 32
    C_OUT, KSIZE, DIL = 8, 3, 1

    key = jax.random.PRNGKey(0)
    k_x, k_p = jax.random.split(key)
    x = jax.random.normal(k_x, (N, C_IN, H, W), jnp.float32)
    params = init_params(k_p, C_IN, C_OUT, KSIZE)

    # block_target_positions=128 -> 128-position (4-row) tiles, grid=(2, 2):
    # exercises the multi-block pipelined path even at demo sizes.
    out = gauss_black_forward(x, params, kernel_size=KSIZE, dilation=DIL,
                              block_target_positions=128)
    out = jax.block_until_ready(out)

    ref = reference_forward(x, params, kernel_size=KSIZE, dilation=DIL)
    assert out.shape == (N, C_OUT, H, W), out.shape
    max_err = float(jnp.max(jnp.abs(out - ref)))
    assert jnp.allclose(out, ref, atol=3e-3, rtol=3e-2), max_err

    print("KERNEL_OK")
</pallas_src>

<mosaic_0001>
module attributes {stable_mosaic.version = 11 : i64} {
  func.func @gauss_black_kernel(%arg0: i32, %arg1: i32, %arg2: memref<1x4x128xf32, #tpu.memory_space<vmem>>, %arg3: memref<3x8x4xf32, #tpu.memory_space<vmem>>, %arg4: memref<8x24xf32, #tpu.memory_space<vmem>>, %arg5: memref<8x4xf32, #tpu.memory_space<vmem>>, %arg6: memref<8x1xf32, #tpu.memory_space<vmem>>, %arg7: memref<8x1xf32, #tpu.memory_space<vmem>>, %arg8: memref<8x1xf32, #tpu.memory_space<vmem>>, %arg9: memref<1x8x128xf32, #tpu.memory_space<vmem>>) attributes {dimension_semantics = [#tpu.dimension_semantics<parallel>, #tpu.dimension_semantics<parallel>], iteration_bounds = array<i64: 2, 2>, scalar_prefetch = 0 : i64, scratch_operands = 0 : i64, tpu.core_type = #tpu.core_type<tc>, window_params = [{transform_indices = @transform_0, window_bounds = array<i64: 1, 4, 128>}, {pipeline_mode = #tpu.pipeline_mode<synchronous>, transform_indices = @transform_1, window_bounds = array<i64: 3, 8, 4>}, {pipeline_mode = #tpu.pipeline_mode<synchronous>, transform_indices = @transform_2, window_bounds = array<i64: 8, 24>}, {pipeline_mode = #tpu.pipeline_mode<synchronous>, transform_indices = @transform_3, window_bounds = array<i64: 8, 4>}, {pipeline_mode = #tpu.pipeline_mode<synchronous>, transform_indices = @transform_4, window_bounds = array<i64: 8, 1>}, {pipeline_mode = #tpu.pipeline_mode<synchronous>, transform_indices = @transform_5, window_bounds = array<i64: 8, 1>}, {pipeline_mode = #tpu.pipeline_mode<synchronous>, transform_indices = @transform_6, window_bounds = array<i64: 8, 1>}, {transform_indices = @transform_7, window_bounds = array<i64: 1, 8, 128>}]} {
    %c0 = arith.constant 0 : index
    %c0_0 = arith.constant 0 : index
    %c0_1 = arith.constant 0 : index
    %0 = vector.load %arg2[%c0, %c0_0, %c0_1] : memref<1x4x128xf32, #tpu.memory_space<vmem>>, vector<1x4x128xf32>
    %1 = vector.shape_cast %0 : vector<1x4x128xf32> to vector<4x128xf32>
    %2 = tpu.iota {dimensions = array<i32: 1>} : vector<1x128xi32>
    %c32_i32 = arith.constant 32 : i32
    %c0_i32 = arith.constant 0 : i32
    %3 = arith.cmpi eq, %c32_i32, %c0_i32 : i32
    %c1_i32 = arith.constant 1 : i32
    %4 = arith.select %3, %c1_i32, %c32_i32 : i32
    %5 = vector.broadcast %4 : i32 to vector<1x128xi32>
    %6 = arith.remsi %2, %5 : vector<1x128xi32>
    %c0_i32_2 = arith.constant 0 : i32
    %7 = vector.broadcast %c0_i32_2 : i32 to vector<1x128xi32>
    %8 = arith.cmpi ne, %6, %7 : vector<1x128xi32>
    %c0_i32_3 = arith.constant 0 : i32
    %9 = vector.broadcast %c0_i32_3 : i32 to vector<1x128xi32>
    %10 = arith.cmpi slt, %6, %9 : vector<1x128xi32>
    %c0_i32_4 = arith.constant 0 : i32
    %11 = arith.cmpi slt, %4, %c0_i32_4 : i32
    %12 = vector.broadcast %11 : i1 to vector<1x128xi1>
    %13 = vector.broadcast %12 : vector<1x128xi1> to vector<1x128xi1>
    %14 = arith.xori %10, %13 : vector<1x128xi1>
    %15 = arith.andi %14, %8 : vector<1x128xi1>
    %16 = vector.broadcast %4 : i32 to vector<1x128xi32>
    %17 = arith.addi %6, %16 : vector<1x128xi32>
    %18 = arith.select %15, %17, %6 : vector<1x128xi1>, vector<1x128xi32>
    %c0_5 = arith.constant 0 : index
    %c0_6 = arith.constant 0 : index
    %c0_7 = arith.constant 0 : index
    %19 = vector.load %arg3[%c0_5, %c0_6, %c0_7] : memref<3x8x4xf32, #tpu.memory_space<vmem>>, vector<1x8x4xf32>
    %20 = vector.shape_cast %19 : vector<1x8x4xf32> to vector<8x4xf32>
    %cst = arith.constant dense<0.000000e+00> : vector<8x128xf32>
    %21 = tpu.matmul %20, %1, %cst {dimension_numbers = #tpu.dot_dimension_numbers<[1], [0], [0], [1], [0, 0, 1, 1], [], []>} : vector<8x4xf32>, vector<4x128xf32>, vector<8x128xf32> -> vector<8x128xf32>
    %c1_i32_8 = arith.constant 1 : i32
    %22 = vector.broadcast %c1_i32_8 : i32 to vector<1x128xi32>
    %23 = arith.cmpi sge, %18, %22 : vector<1x128xi32>
    %c1_i32_9 = arith.constant 1 : i32
    %24 = tpu.dynamic_rotate %1 by %c1_i32_9 dim 1 : vector<4x128xf32>, i32 -> vector<4x128xf32>
    %cst_10 = arith.constant 0.000000e+00 : f32
    %25 = vector.shape_cast %23 : vector<1x128xi1> to vector<1x128xi1>
    %26 = vector.broadcast %25 : vector<1x128xi1> to vector<4x128xi1>
    %27 = vector.broadcast %cst_10 : f32 to vector<4x128xf32>
    %28 = arith.select %26, %24, %27 : vector<4x128xi1>, vector<4x128xf32>
    %c1 = arith.constant 1 : index
    %c0_11 = arith.constant 0 : index
    %c0_12 = arith.constant 0 : index
    %29 = vector.load %arg3[%c1, %c0_11, %c0_12] : memref<3x8x4xf32, #tpu.memory_space<vmem>>, vector<1x8x4xf32>
    %30 = vector.shape_cast %29 : vector<1x8x4xf32> to vector<8x4xf32>
    %cst_13 = arith.constant dense<0.000000e+00> : vector<8x128xf32>
    %31 = tpu.matmul %30, %28, %cst_13 {dimension_numbers = #tpu.dot_dimension_numbers<[1], [0], [0], [1], [0, 0, 1, 1], [], []>} : vector<8x4xf32>, vector<4x128xf32>, vector<8x128xf32> -> vector<8x128xf32>
    %32 = arith.addf %21, %31 : vector<8x128xf32>
    %c2_i32 = arith.constant 2 : i32
    %33 = vector.broadcast %c2_i32 : i32 to vector<1x128xi32>
    %34 = arith.cmpi sge, %18, %33 : vector<1x128xi32>
    %c2_i32_14 = arith.constant 2 : i32
    %35 = tpu.dynamic_rotate %1 by %c2_i32_14 dim 1 : vector<4x128xf32>, i32 -> vector<4x128xf32>
    %cst_15 = arith.constant 0.000000e+00 : f32
    %36 = vector.shape_cast %34 : vector<1x128xi1> to vector<1x128xi1>
    %37 = vector.broadcast %36 : vector<1x128xi1> to vector<4x128xi1>
    %38 = vector.broadcast %cst_15 : f32 to vector<4x128xf32>
    %39 = arith.select %37, %35, %38 : vector<4x128xi1>, vector<4x128xf32>
    %c2 = arith.constant 2 : index
    %c0_16 = arith.constant 0 : index
    %c0_17 = arith.constant 0 : index
    %40 = vector.load %arg3[%c2, %c0_16, %c0_17] : memref<3x8x4xf32, #tpu.memory_space<vmem>>, vector<1x8x4xf32>
    %41 = vector.shape_cast %40 : vector<1x8x4xf32> to vector<8x4xf32>
    %cst_18 = arith.constant dense<0.000000e+00> : vector<8x128xf32>
    %42 = tpu.matmul %41, %39, %cst_18 {dimension_numbers = #tpu.dot_dimension_numbers<[1], [0], [0], [1], [0, 0, 1, 1], [], []>} : vector<8x4xf32>, vector<4x128xf32>, vector<8x128xf32> -> vector<8x128xf32>
    %43 = arith.addf %32, %42 : vector<8x128xf32>
    %c0_19 = arith.constant 0 : index
    %c0_20 = arith.constant 0 : index
    %44 = vector.load %arg6[%c0_19, %c0_20] : memref<8x1xf32, #tpu.memory_space<vmem>>, vector<8x1xf32>
    %45 = vector.broadcast %44 : vector<8x1xf32> to vector<8x128xf32>
    %46 = arith.addf %43, %45 : vector<8x128xf32>
    %47 = math.tanh %46 : vector<8x128xf32>
    %c1_i32_21 = arith.constant 1 : i32
    %48 = vector.broadcast %c1_i32_21 : i32 to vector<1x128xi32>
    %49 = arith.cmpi sge, %18, %48 : vector<1x128xi32>
    %c1_i32_22 = arith.constant 1 : i32
    %50 = tpu.dynamic_rotate %47 by %c1_i32_22 dim 1 : vector<8x128xf32>, i32 -> vector<8x128xf32>
    %cst_23 = arith.constant 0.000000e+00 : f32
    %51 = vector.shape_cast %49 : vector<1x128xi1> to vector<1x128xi1>
    %52 = vector.broadcast %51 : vector<1x128xi1> to vector<8x128xi1>
    %53 = vector.broadcast %cst_23 : f32 to vector<8x128xf32>
    %54 = arith.select %52, %50, %53 : vector<8x128xi1>, vector<8x128xf32>
    %c2_i32_24 = arith.constant 2 : i32
    %55 = vector.broadcast %c2_i32_24 : i32 to vector<1x128xi32>
    %56 = arith.cmpi sge, %18, %55 : vector<1x128xi32>
    %c2_i32_25 = arith.constant 2 : i32
    %57 = tpu.dynamic_rotate %47 by %c2_i32_25 dim 1 : vector<8x128xf32>, i32 -> vector<8x128xf32>
    %cst_26 = arith.constant 0.000000e+00 : f32
    %58 = vector.shape_cast %56 : vector<1x128xi1> to vector<1x128xi1>
    %59 = vector.broadcast %58 : vector<1x128xi1> to vector<8x128xi1>
    %60 = vector.broadcast %cst_26 : f32 to vector<8x128xf32>
    %61 = arith.select %59, %57, %60 : vector<8x128xi1>, vector<8x128xf32>
    %62 = tpu.concatenate %47, %54, %61 in 0 : vector<8x128xf32>, vector<8x128xf32>, vector<8x128xf32> -> vector<24x128xf32>
    %c0_27 = arith.constant 0 : index
    %c0_28 = arith.constant 0 : index
    %63 = vector.load %arg4[%c0_27, %c0_28] : memref<8x24xf32, #tpu.memory_space<vmem>>, vector<8x24xf32>
    %cst_29 = arith.constant dense<0.000000e+00> : vector<8x128xf32>
    %64 = tpu.matmul %63, %62, %cst_29 {dimension_numbers = #tpu.dot_dimension_numbers<[1], [0], [0], [1], [0, 0, 1, 1], [], []>} : vector<8x24xf32>, vector<24x128xf32>, vector<8x128xf32> -> vector<8x128xf32>
    %c0_30 = arith.constant 0 : index
    %c0_31 = arith.constant 0 : index
    %65 = vector.load %arg7[%c0_30, %c0_31] : memref<8x1xf32, #tpu.memory_space<vmem>>, vector<8x1xf32>
    %66 = vector.broadcast %65 : vector<8x1xf32> to vector<8x128xf32>
    %67 = arith.addf %64, %66 : vector<8x128xf32>
    %68 = math.tanh %67 : vector<8x128xf32>
    %c0_32 = arith.constant 0 : index
    %c0_33 = arith.constant 0 : index
    %69 = vector.load %arg5[%c0_32, %c0_33] : memref<8x4xf32, #tpu.memory_space<vmem>>, vector<8x4xf32>
    %cst_34 = arith.constant dense<0.000000e+00> : vector<8x128xf32>
    %70 = tpu.matmul %69, %1, %cst_34 {dimension_numbers = #tpu.dot_dimension_numbers<[1], [0], [0], [1], [0, 0, 1, 1], [], []>} : vector<8x4xf32>, vector<4x128xf32>, vector<8x128xf32> -> vector<8x128xf32>
    %c0_35 = arith.constant 0 : index
    %c0_36 = arith.constant 0 : index
    %71 = vector.load %arg8[%c0_35, %c0_36] : memref<8x1xf32, #tpu.memory_space<vmem>>, vector<8x1xf32>
    %72 = vector.broadcast %71 : vector<8x1xf32> to vector<8x128xf32>
    %73 = arith.addf %70, %72 : vector<8x128xf32>
    %74 = arith.addf %68, %73 : vector<8x128xf32>
    %cst_37 = arith.constant 0.000000e+00 : f32
    %75 = vector.broadcast %cst_37 : f32 to vector<8x128xf32>
    %76 = arith.maximumf %74, %75 : vector<8x128xf32>
    %c0_38 = arith.constant 0 : index
    %c0_39 = arith.constant 0 : index
    %c0_40 = arith.constant 0 : index
    %77 = vector.load %arg9[%c0_38, %c0_39, %c0_40] : memref<1x8x128xf32, #tpu.memory_space<vmem>>, vector<1x8x128xf32>
    %78 = vector.shape_cast %77 : vector<1x8x128xf32> to vector<8x128xf32>
    %79 = vector.shape_cast %76 : vector<8x128xf32> to vector<1x8x128xf32>
    tpu.vector_store %arg9[%c0_38, %c0_39, %c0_40], %79 {strides = array<i32>} : memref<1x8x128xf32, #tpu.memory_space<vmem>>, vector<1x8x128xf32>,
    return
  }
  func.func @transform_0(%arg0: i32, %arg1: i32) -> (i32, i32, i32) {
    %c0_i32 = arith.constant 0 : i32
    %c0_i32_0 = arith.constant 0 : i32
    return %arg0, %c0_i32, %arg1 : i32, i32, i32
  }
  func.func @transform_1(%arg0: i32, %arg1: i32) -> (i32, i32, i32) {
    %c0_i32 = arith.constant 0 : i32
    %c0_i32_0 = arith.constant 0 : i32
    %c0_i32_1 = arith.constant 0 : i32
    %c0_i32_2 = arith.constant 0 : i32
    return %c0_i32, %c0_i32_0, %c0_i32_1 : i32, i32, i32
  }
  func.func @transform_2(%arg0: i32, %arg1: i32) -> (i32, i32) {
    %c0_i32 = arith.constant 0 : i32
    %c0_i32_0 = arith.constant 0 : i32
    %c0_i32_1 = arith.constant 0 : i32
    return %c0_i32, %c0_i32_0 : i32, i32
  }
  func.func @transform_3(%arg0: i32, %arg1: i32) -> (i32, i32) {
    %c0_i32 = arith.constant 0 : i32
    %c0_i32_0 = arith.constant 0 : i32
    %c0_i32_1 = arith.constant 0 : i32
    return %c0_i32, %c0_i32_0 : i32, i32
  }
  func.func @transform_4(%arg0: i32, %arg1: i32) -> (i32, i32) {
    %c0_i32 = arith.constant 0 : i32
    %c0_i32_0 = arith.constant 0 : i32
    %c0_i32_1 = arith.constant 0 : i32
    return %c0_i32, %c0_i32_0 : i32, i32
  }
  func.func @transform_5(%arg0: i32, %arg1: i32) -> (i32, i32) {
    %c0_i32 = arith.constant 0 : i32
    %c0_i32_0 = arith.constant 0 : i32
    %c0_i32_1 = arith.constant 0 : i32
    return %c0_i32, %c0_i32_0 : i32, i32
  }
  func.func @transform_6(%arg0: i32, %arg1: i32) -> (i32, i32) {
    %c0_i32 = arith.constant 0 : i32
    %c0_i32_0 = arith.constant 0 : i32
    %c0_i32_1 = arith.constant 0 : i32
    return %c0_i32, %c0_i32_0 : i32, i32
  }
  func.func @transform_7(%arg0: i32, %arg1: i32) -> (i32, i32, i32) {
    %c0_i32 = arith.constant 0 : i32
    %c0_i32_0 = arith.constant 0 : i32
    return %arg0, %c0_i32, %arg1 : i32, i32, i32
  }
}

</mosaic_0001>

<bundles_post_ra>
// kernel: tpu_custom_call.1
= control target key start
LH: loop header
LB: loop body
LE: loop exit
PB: predicated region body
PF: predicated region fallthrough
CT: control target
= control target key end

     0   :  { %12 = vsyncpa [#allocation3], 0  ;;  %s1320_s0 = inlined_call_operand.vmem [shape: f32[2,4,256], index: 0, kind: input, shape index: {}]   ;;  %s1321_s1 = inlined_call_operand.vmem [shape: f32[3,8,4], index: 1, kind: input, shape index: {}]   ;;  %s1322_s2 = inlined_call_operand.vmem [shape: f32[8,24], index: 2, kind: input, shape index: {}]   ;;  %s1323_s3 = inlined_call_operand.vmem [shape: f32[8,4], index: 3, kind: input, shape index: {}]   ;;  %s1324_s4 = inlined_call_operand.vmem [shape: f32[8,1], index: 4, kind: input, shape index: {}]   ;;  %s1325_s5 = inlined_call_operand.vmem [shape: f32[8,1], index: 5, kind: input, shape index: {}]   ;;  %s1326_s6 = inlined_call_operand.vmem [shape: f32[8,1], index: 6, kind: input, shape index: {}]   ;;  %s1327_s7 = inlined_call_operand.hbm [shape: f32[2,8,256], index: 7, kind: output, shape index: {}]  }
   0x1   :  { %14 = vsyncpa [#allocation3 + $0x1], 0  ;;  %s1127_s24 = smov 0   ;;  %s1129_s25 = smov 0  }
   0x2   :  { %s1131_s26 = smov 0   ;;  %s1133_s27 = smov 0  }
   0x3   :  { %s1135_s28 = smov 0   ;;  %s1137_s29 = smov 0  }
   0x4   :  { %s1139_s30 = smov 0   ;;  %s1141_s8 = smov 0  }
   0x5 LB: > { %s838_s9 = sadd.s32 4294967295, %s1079_s8   ;;  %s839_s10 = sadd.s32 4294967294, %s1079_s8   ;;  %s1079_s8 = sphi %s1141_s8, %s20_s8   ;;  %s1075_s30 = sphi %s1139_s30, %s1346_s30   ;;  %s1071_s29 = sphi %s1137_s29, %s1345_s29   ;;  %s1067_s28 = sphi %s1135_s28, %s1344_s28   ;;  %s1063_s27 = sphi %s1133_s27, %s1343_s27   ;;  %s1059_s26 = sphi %s1131_s26, %s1342_s26   ;;  %s1055_s25 = sphi %s1129_s25, %s1341_s25   ;;  %s1051_s24 = sphi %s1127_s24, %s1340_s24  }
   0x6   : > { %s29_s11 = sadd.s32 1, %s1071_s29  ;;  %s32_s12 = sadd.s32 1, %s1075_s30 }
   0x7   : > { %p30_p0 = scmp.ge.s32.totalorder %s29_s11, 2  ;;  %p205_p1 = scmp.ne.s32.totalorder %s1059_s26, %s1055_s25 }
   0x8   : > { %p206_p2 = scmp.eq.s32.totalorder %s838_s9, 3  ;;  %p211_p5 = scmp.ne.s32.totalorder %s1055_s25, %s1051_s24 }
   0x9   : > { %s1348_s11 = smov (%p30_p0, %s29_s11), 0  ;;  %s1350_s12 = smov (!%p30_p0, %s32_s12), %s1075_s30 }
   0xa   : > { %1330 = sst [smem:[#allocation5_spill]] %s1348_s11  ;;  %s191_s13 = ssub.s32 %s1071_s29, %s1348_s11 }
   0xb   : > { %p1178_p3 = por %p206_p2, %p205_p1  ;;  %p34_p4 = scmp.ge.s32.totalorder %s1350_s12, 2 }
   0xc   : > { %p212_p6 = scmp.eq.s32.totalorder %s839_s10, 3  ;;  %p842_p7 = scmp.ge.s32.totalorder %s1079_s8, 1 }
   0xd   : > { %s1352_s12 = smov (%p34_p4, %s1350_s12), 0  ;;  %p259_p9 = scmp.lt.s32.totalorder %s1079_s8, 5 }
   0xe   : > { %1332 = sst [smem:[#allocation6_spill]] %s1352_s12  ;;  %p1187_p8 = por %p212_p6, %p211_p5 }
   0xf   : > { %s190_s16 = ssub.s32 %s1075_s30, %s1352_s12  ;;  %s195_s17 = sadd.s32 1, %s1059_s26 }
  0x10   : > { %s192_s18 = sor.u32 %s191_s13, %s190_s16  ;;  %p260_p10 = pnand %p842_p7, %p259_p9 }
  0x11   : > { %p193_p11 = scmp.eq.s32.totalorder %s192_s18, 0  ;;  %p294_p12 = scmp.lt.s32.totalorder (!%p260_p10), %s1067_s28, 1 }
  0x12   : > { %263 = sbr.rel (%p260_p10) target bundleno = 708 (0x2c4), region = 48  ;;  %p296_p13 = scmp.lt.s32.totalorder (!%p260_p10), %s1063_s27, 1 }
  0x13   : > { %s1196_s19 = scalar_select %p193_p11, %s1059_s26, %s195_s17  }
  0x14   : > { %s1084_s21 = smov (!%p260_p10), 1   ;;  %s291_s11 = sand.u32 (!%p260_p10), 1, %s1055_s25  }
  0x15   : > { %s843_s12 = sshll.u32 (!%p260_p10), %s291_s11, 3  ;;  %s860_s22 = sshll.u32 (!%p260_p10), %s1067_s28, 1 }
  0x17   : > { %v1081_v0 = vmov 0.0   ;;  %vm1082_vm0 = vmmov 0   ;;  %s295_s20 = scalar_select %p294_p12, %s1067_s28, 1  ;;  %v565_v1 = vld [vmem:[%s1324_s4] sm:$0xff]  ;;  %v1083_v2 = vmov 0   ;;  %vm330_vm1 = vcmask 1043456  }
  0x18   : > { %876 = vmatprep.subr.mxu0 %v1081_v0  ;;  %878 = vmatprep.mubr.msk.f32.mxu0 %vm1082_vm0, %v1081_v0  ;;  %s297_s23 = scalar_select %p296_p13, %s1063_s27, 1  ;;  %vm326_vm2 = vcmask 31744   ;;  %v317_v3 = vld [vmem:[%s1321_s1] sm:$0xff]  ;;  %v303_v5 = vlaneseq  ;;  %v846_v10 = vld [vmem:[%s1321_s1 + $0x8] sm:$0xff]  ;;  %v851_v14 = vld [vmem:[%s1321_s1 + $0x10] sm:$0xff]  ;;  %vm586_vm5 = vcmask 195584  }
  0x19   : > { %881 = vmatprep.subr.mxu1 %v1081_v0  ;;  %883 = vmatprep.mubr.msk.f32.mxu1 %vm1082_vm0, %v1081_v0  ;;  %s844_s9 = sshll.u32 %s295_s20, 1  ;;  %s1085_s20 = smov 2   ;;  %v661_v27 = vld [vmem:[%s1323_s3] sm:$0xff] }
  0x1a   : > { %981 = vset.pattern.permute.xlu1 %v1083_v2  ;;  %982 = vset.pattern.permute.xlu0 %v1083_v2  ;;  %s299_s10 = sadd.s32 %s844_s9, %s297_s23  ;;  %v304_v6 = vand.u32 127, %v303_v5  ;;  %v580_v28 = vld [vmem:[%s1325_s5] sm:$0xff]  ;;  %s756_s23 = sadd.s32 %s1063_s27, %s860_s22 }
  0x1b   : > { %568 = vperm.xlu1 %981, %v565_v1   ;;  %s845_s13 = sshll.u32 %s299_s10, 2  ;;  %v662_v29 = vld [vmem:[%s1326_s6] sm:$0xff]  ;;  %s861_s9 = sshll.u32 %s756_s23, 7 }
  0x1c   : > { %s301_s18 = scalar_lea.vmem %s1320_s0, %s845_s13  ;;  %v309_v7 = vand.u32 31, %v304_v6  ;;  %v579_v32 = vld [vmem:[%s1322_s2] sm:$0xff]  ;;  %s293_s10 = scalar_lea.vmem [#allocation2], %s843_s12 }
  0x1d   : > { %v302_v4 = vld [vmem:[%s301_s18] sm:$0xf]  ;;  %s760_s13 = sshll.u32 %s293_s10, 4  ;;  %s758_s18 = scalar_lea.hbm %s1327_s7, %s861_s9  ;;  %s761_s13 = int_to_ptr.vmem [resolvable:$true] %s760_s13 }
  0x1e   : > { %319 = vrot.lane.b32.xlu0 %v302_v4, %s1084_s21  ;;  %882 = vmatpush3.msk.msra.mxu1 %vm330_vm1, %v302_v4  ;;  %vm1224_vm3 = vcmp.ge.s32.totalorder %v309_v7, 1  ;;  %vm1234_vm4 = vcmp.ge.s32.totalorder %v309_v7, 2  ;;  %s1086_s28 = smov [#allocation2]  }
  0x1f   : > { %884 = vmatmul.mubr.msk.f32.vlgmr.msra.gmra.mxu1 %vm326_vm2, %v317_v3  ;;  %891 = vmatprep.subr.mxu1 %v1081_v0  ;;  %s991_s27 = sshll.u32 %s1086_s28, 4  ;;  %s992_s27 = int_to_ptr.vmem [resolvable:$false] %s991_s27 }
  0x20   : > { %897 = vmatprep.mubr.msk.f32.mxu1 %vm1082_vm0, %v1081_v0  ;;  %s993_s22 = scalar_lea.vmem %s992_s27, 256  ;;  %p994_p4 = scmp.lt.s32.totalorder %s761_s13, %s992_s27 }
  0x22   : > { %481 = vrot.lane.b32.xlu0 %v302_v4, %s1085_s20 }
  0x90   : > { %v320_v9 = vpop.permute.xlu0 %319 }
  0x91   : > { %v323_v11 = vsel %vm1224_vm3, %v320_v9, 0.0 }
  0x92   : > { %877 = vmatpush3.msk.msra.mxu0 %vm330_vm1, %v323_v11 }
  0x93   : > { %879 = vmatmul.mubr.msk.f32.vlgmr.msra.gmra.mxu0 %vm326_vm2, %v846_v10  ;;  %886 = vmatprep.subr.mxu0 %v1081_v0 }
  0x94   : > { %v482_v13 = vpop.permute.xlu0 %481  ;;  %888 = vmatprep.mubr.msk.f32.mxu0 %vm1082_vm0, %v1081_v0 }
  0x95   : > { %v485_v15 = vsel %vm1234_vm4, %v482_v13, 0.0 }
  0x96   : > { %887 = vmatpush3.msk.msra.mxu0 %vm330_vm1, %v485_v15  ;;  %v569_v22 = vpop.permute.xlu1 %568 }
  0x97   : > { %889 = vmatmul.mubr.msk.f32.vlgmr.msra.gmra.mxu0 %vm326_vm2, %v851_v14  ;;  %900 = vmatprep.subr.mxu0 %v1081_v0 }
  0x98   : > { %901 = vmatpush3.msk.msra.mxu0 %vm330_vm1, %v302_v4  ;;  %902 = vmatprep.mubr.msk.f32.mxu0 %vm1082_vm0, %v1081_v0 }
  0x9b   : > { %903 = vmatmul.mubr.msk.f32.vlgmr.msra.gmra.mxu0 %vm326_vm2, %v661_v27 }
  0xdf   : > { %v476_v16 = vpop.f32.mrf.mxu1 }
  0xe1   : > { %v885_v17 = vpop.f32.mrf.mxu1 }
 0x153   : > { %v400_v18 = vpop.f32.mrf.mxu0 }
 0x154   : > { %v477_v20 = vadd.f32 %v476_v16, %v400_v18 }
 0x155   : > { %v880_v19 = vpop.f32.mrf.mxu0 }
 0x157   : > { %v560_v21 = vpop.f32.mrf.mxu0 }
 0x158   : > { %v564_v23 = vadd.f32 %v560_v21, %v477_v20 }
 0x159   : > { %v890_v24 = vpop.f32.mrf.mxu0 }
 0x15a   : > { %v571_v25 = vadd.f32 %v569_v22, %v564_v23 }
 0x15b   : > { %v737_v33 = vpop.f32.mrf.mxu0 }
 0x15c   : > { %983 = vtanh.f32 %v571_v25 }
 0x15d   : > { %v904_v34 = vpop.f32.mrf.mxu0 }
 0x169   : > { %v984_v26 = vpop.eup %983 }
 0x16a   : > { %576 = vrot.lane.b32.xlu1 %v984_v26, %s1085_s20  ;;  %573 = vrot.lane.b32.xlu0 %v984_v26, %s1084_s21  ;;  %s745_s21 = scalar_lea.sflag [#allocation3], %s291_s11  ;;  %s987_s20 = scalar_lea.vmem %s761_s13, 128 }
 0x16b   : > { %p988_p0 = scmp.ne.s32.totalorder %s761_s13, %s987_s20  ;;  %p995_p5 = scmp.lt.s32.totalorder %s993_s22, %s987_s20 }
 0x16d   : > { %p989_p1 = pnand %p988_p0, %p1178_p3  ;;  %p996_p6 = por %p995_p5, %p994_p4 }
 0x16e   : > { %583 = vperm.xlu1 %981, %v580_v28   ;;  %665 = vperm.xlu0 %982, %v662_v29  }
 0x16f   : > { %p990_p2 = pneg %p989_p1 }
 0x171   : > { %p997_p7 = pnand %p996_p6, %p990_p2 }
 0x1dc   : > { %v577_v30 = vpop.permute.xlu1 %576  ;;  %v574_v31 = vpop.permute.xlu0 %573 }
 0x1dd   : > { %892 = vmatpush3.msk.msra.mxu1 %vm1234_vm4, %v577_v30 }
 0x1de   : > { %893 = vmatprep.subr.mxu1 %v1081_v0 }
 0x1df   : > { %894 = vmatpush3.msk.msra.mxu1 %vm1224_vm3, %v574_v31 }
 0x1e0   : > { %895 = vmatprep.subr.mxu1 %v1081_v0 }
 0x1e1   : > { %896 = vmatpush3.msra.mxu1 %v984_v26 }
 0x1e2   : > { %898 = vmatmul.mubr.msk.f32.vlgmr.msra.gmra.mxu1 %vm586_vm5, %v579_v32 }
 0x1e9   : > { %v584_v35 = vpop.permute.xlu1 %583  ;;  %v666_v39 = vpop.permute.xlu0 %665 }
 0x1ea   : > { %v738_v40 = vadd.f32 %v737_v33, %v666_v39 }
 0x2a2   : > { %v656_v36 = vpop.f32.mrf.mxu1 }
 0x2a3   : > { %v657_v37 = vadd.f32 %v656_v36, %v584_v35 }
 0x2a4   : > { %v899_v38 = vpop.f32.mrf.mxu1 }
 0x2a5   : > { %985 = vtanh.f32 %v657_v37 }
 0x2b2   : > { %v986_v41 = vpop.eup %985 }
 0x2b3   : > { %v741_v42 = vadd.f32 %v986_v41, %v738_v40 }
 0x2b5   : > { %v742_v43 = vmax.f32 %v741_v42, 0.0 }
 0x2b7   : > { %743 = vst [vmem:[%s293_s10] sm:$0xff] %v742_v43 }
 0x2b8   : > { %1000 = shalt.err (!%p997_p7)
}
 0x2b9   : > { %s1001_s12 = scalar_lea.hbm %s758_s18, 128  ;;  %s1005_s9 = scalar_lea.hbm %s1327_s7, 512 }
 0x2ba   : > { %p1002_p9 = scmp.ne.s32.totalorder %s758_s18, %s1001_s12  ;;  %p1006_p12 = scmp.lt.s32.totalorder %s758_s18, %s1327_s7 }
 0x2bb   : > { %p1007_p13 = scmp.lt.s32.totalorder %s1005_s9, %s1001_s12 }
 0x2bc   : > { %p1003_p10 = pnand %p1002_p9, %p1178_p3 }
 0x2bd   : > { %p1008_p0 = por %p1007_p13, %p1006_p12 }
 0x2be   : > { %p1004_p11 = pneg %p1003_p10 }
 0x2c0   : > { %p1009_p1 = pnand %p1008_p0, %p1004_p11 }
 0x2c2   : > { %1012 = shalt.err (!%p1009_p1)
}
 0x2c3   : > { %905 = dma.vmem_to_hbm [thread:$0]  (%p1178_p3), %s761_s13, 128, %s758_s18, %s745_s21  }
 0x2c4 PF: > { %p911_p2 = scmp.ge.s32.totalorder %s1079_s8, 2  ;;  %s772_s17 = sand.u32 1, %s1051_s24  }
 0x2c5   : > { %s773_s20 = scalar_lea.sflag [#allocation3], %s772_s17 }
 0x2c6   : > { %p908_p4 = pnand %p911_p2, %p1187_p8 }
 0x2c8   : > { %p909_p5 = pneg %p908_p4 }
 0x2ca   : > { %1046 = dma.done.wait (%p909_p5), %s773_s20, 128  }
 0x2cb   : > { %1048 = vsyncadd (%p909_p5), %s773_s20, 4294967168  ;;  %s20_s8 = sadd.s32 1, %s1079_s8   ;;  %s1338_s14 = sld [smem:[#allocation5_spill]] }
 0x2cc   : > { %p17_p6 = scmp.ge.s32.totalorder %s20_s8, 6   ;;  %s1339_s13 = sld [smem:[#allocation6_spill]] }
 0x2cd   : > { %s1340_s24 = smov %s1055_s25  ;;  %s1341_s25 = smov %s1059_s26 }
 0x2ce   : > { %s1342_s26 = smov %s1196_s19  ;;  %s1343_s27 = smov %s1071_s29 }
 0x2cf   : > { %s1344_s28 = smov %s1075_s30  ;;  %19 = sbr.rel (!%p17_p6) target bundleno = 5 (0x5), region = 85 }
 0x2d1   : > { %s1345_s29 = smov %s1338_s14 }
 0x2d2   : > { %s1346_s30 = smov %s1339_s13 }
 0x2d4   :  { %778 = vsyncpa [#allocation3], 1 }
 0x2d5   :  { %780 = vsyncpa [#allocation3 + $0x1], 1 }

</bundles_post_ra>
